<compile_context>
chip_gen: v5e
topology: v5e:2x2
jax: 0.10.0
libtpu: 0.0.40
codegen_flags: <defaults>
</compile_context>

<pallas_src>
import functools

import jax
import jax.numpy as jnp
from jax import lax
from jax.experimental import pallas as pl
from jax.experimental.pallas import tpu as pltpu

EPS = 0.2      # label smoothing factor (hardcoded in the PyTorch module)
LANE = 128     # TPU lane width


def _round_up(x, m):
    return ((x + m - 1) // m) * m


def _smooth_ce_kernel(pred_ref, tgt_ref, out_ref, acc_ref, *, n_true,
                      tiles_per_split):
    """One lane-dense (C, TILE_N) tile of label-smoothed cross entropy.

    pred_ref: (C, TILE_N) logits, native dtype (cast to f32 on-chip)
    tgt_ref:  (1, TILE_N) int32 labels
    out_ref:  (1, 8, LANE) f32 per-split partial sum (written at last tile)
    acc_ref:  (1, TILE_N) f32 running per-column loss accumulator (scratch)
    """
    s = pl.program_id(0)                 # split (parallel; per-TC on v7x)
    i = pl.program_id(1)                 # row tile within split (arbitrary)
    n_tiles = pl.num_programs(1)

    @pl.when(i == 0)
    def _init():
        acc_ref[...] = jnp.zeros_like(acc_ref)

    x = pred_ref[...].astype(jnp.float32)            # (C, TILE_N)
    c, tn = x.shape

    # log-softmax over the class (sublane) axis, numerically stable.
    m = jnp.max(x, axis=0, keepdims=True)            # (1, TILE_N)
    shifted = x - m
    lse = jnp.log(jnp.sum(jnp.exp(shifted), axis=0, keepdims=True))
    log_prb = shifted - lse                          # (C, TILE_N)

    # Algebraic label smoothing (no smoothed one-hot materialization):
    #   loss_row = -[(1-eps)*lp[t] + eps/(C-1)*(sum_c lp - lp[t])]
    #            = -[coef_hot*lp[t] + coef_off*sum_c lp]
    tgt = tgt_ref[...]                                        # (1, TILE_N)
    cls_ids = lax.broadcasted_iota(jnp.int32, (c, tn), 0)     # (C, TILE_N)
    lp_hot = jnp.sum(jnp.where(cls_ids == tgt, log_prb, 0.0),
                     axis=0, keepdims=True)                   # (1, TILE_N)
    lp_sum = jnp.sum(log_prb, axis=0, keepdims=True)          # (1, TILE_N)

    coef_off = EPS / (c - 1)
    coef_hot = 1.0 - EPS - coef_off
    per_row = -(coef_hot * lp_hot + coef_off * lp_sum)        # (1, TILE_N)

    # Mask padded rows (global column index >= true N).
    col0 = (s * tiles_per_split + i) * tn
    col = col0 + lax.broadcasted_iota(jnp.int32, (1, tn), 1)
    per_row = jnp.where(col < n_true, per_row, 0.0)

    acc_ref[...] += per_row

    @pl.when(i == n_tiles - 1)
    def _finalize():
        total = jnp.sum(acc_ref[...])                         # split partial
        out_ref[...] = jnp.broadcast_to(total, out_ref.shape).astype(jnp.float32)


def get_loss(pred, target, trans_feat=None, smoothing=True, *,
             tile_n=4096, splits=2):
    """JAX/Pallas equivalent of the PyTorch get_loss.forward.

    pred:   (N, C) logits, any float dtype (bf16 passes through, cast on-chip)
    target: integer class labels, flattened to (N,)
    trans_feat: unused (interface parity with the PyTorch module)
    """
    if not smoothing:
        # TODO(synk): plain F.cross_entropy branch not routed through the
        # kernel; the module's default (and only used) path is smoothing=True.
        raise NotImplementedError("only smoothing=True path is implemented")

    n, c = pred.shape
    target = target.reshape(-1).astype(jnp.int32)

    # Lane-dense layout: classes on sublanes, rows on lanes.
    # TODO(synk): ideally the upstream classifier emits (C, N) directly so this
    # transpose (one extra HBM round-trip) disappears.
    pred_t = jnp.transpose(pred)                  # (C, N), native dtype
    tgt_row = target.reshape(1, n)                # (1, N) int32

    # Row tiling: multiples of 128 lanes; `splits` independent partial sums
    # (leading 'parallel' grid axis -> both TensorCores on v7x).
    tile_n = max(LANE, min(int(tile_n), _round_up(pl.cdiv(n, splits), LANE)))
    tile_n = _round_up(tile_n, LANE)
    tiles_per_split = pl.cdiv(n, splits * tile_n)
    n_padded = splits * tiles_per_split * tile_n
    if n_padded != n:
        pad = n_padded - n
        pred_t = jnp.pad(pred_t, ((0, 0), (0, pad)))
        tgt_row = jnp.pad(tgt_row, ((0, 0), (0, pad)))

    kernel = functools.partial(_smooth_ce_kernel, n_true=n,
                               tiles_per_split=tiles_per_split)

    partials = pl.pallas_call(
        kernel,
        out_shape=jax.ShapeDtypeStruct((splits, 8, LANE), jnp.float32),
        grid_spec=pltpu.PrefetchScalarGridSpec(
            num_scalar_prefetch=0,
            grid=(splits, tiles_per_split),
            in_specs=[
                pl.BlockSpec((c, tile_n),
                             lambda s, i: (0, s * tiles_per_split + i)),
                pl.BlockSpec((1, tile_n),
                             lambda s, i: (0, s * tiles_per_split + i)),
            ],
            out_specs=pl.BlockSpec((1, 8, LANE), lambda s, i: (s, 0, 0)),
            scratch_shapes=[pltpu.VMEM((1, tile_n), jnp.float32)],
        ),
        compiler_params=pltpu.CompilerParams(
            dimension_semantics=("parallel", "arbitrary"),
            vmem_limit_bytes=32 * 1024 * 1024,
        ),
    )(pred_t, tgt_row)

    # Every element of a split's (8, LANE) block holds the same partial sum.
    return partials[:, 0, 0].sum() / jnp.float32(n)


def _reference_loss(pred, target):
    """Pure-JAX reference mirroring the PyTorch code (smoothing=True)."""
    n_class = pred.shape[1]
    one_hot = jax.nn.one_hot(target, n_class, dtype=pred.dtype)
    one_hot = one_hot * (1.0 - EPS) + (1.0 - one_hot) * EPS / (n_class - 1)
    log_prb = jax.nn.log_softmax(pred, axis=1)
    return -(one_hot * log_prb).sum(axis=1).mean()


if __name__ == "__main__":
    key = jax.random.PRNGKey(0)
    k1, k2 = jax.random.split(key)

    # Small partseg-like shapes: batch=2, 250 points, 16 part classes.
    # N = 500 is deliberately not a multiple of 128 to exercise the tail mask.
    B, P, C = 2, 250, 16
    N = B * P
    pred = jax.random.normal(k1, (N, C), dtype=jnp.float32).astype(jnp.bfloat16)
    target = jax.random.randint(k2, (N,), 0, C, dtype=jnp.int32)
    trans_feat = jnp.zeros((B, 8, 8), dtype=jnp.float32)   # unused, as in PyTorch

    loss = get_loss(pred, target, trans_feat, smoothing=True)
    loss = jax.block_until_ready(loss)

    ref = _reference_loss(pred.astype(jnp.float32), target)
    assert jnp.allclose(loss, ref, atol=1e-4, rtol=1e-4), (loss, ref)
    print("KERNEL_OK")
</pallas_src>

<mosaic_0001>
module attributes {stable_mosaic.version = 11 : i64} {
  func.func @_smooth_ce_kernel(%arg0: i32, %arg1: i32, %arg2: memref<16x256xbf16, #tpu.memory_space<vmem>>, %arg3: memref<1x256xi32, #tpu.memory_space<vmem>>, %arg4: memref<1x8x128xf32, #tpu.memory_space<vmem>>, %arg5: memref<1x256xf32, #tpu.memory_space<vmem>>) attributes {dimension_semantics = [#tpu.dimension_semantics<parallel>, #tpu.dimension_semantics<arbitrary>], iteration_bounds = array<i64: 2, 1>, scalar_prefetch = 0 : i64, scratch_operands = 1 : i64, tpu.core_type = #tpu.core_type<tc>, window_params = [{transform_indices = @transform_0, window_bounds = array<i64: 16, 256>}, {transform_indices = @transform_1, window_bounds = array<i64: 1, 256>}, {transform_indices = @transform_2, window_bounds = array<i64: 1, 8, 128>}]} {
    %c0_i32 = arith.constant 0 : i32
    %0 = arith.cmpi eq, %arg1, %c0_i32 : i32
    %1 = arith.extui %0 : i1 to i32
    %c0_i32_0 = arith.constant 0 : i32
    %2 = arith.cmpi ne, %1, %c0_i32_0 : i32
    scf.if %2 {
      %cst_18 = arith.constant 0.000000e+00 : f32
      %48 = vector.broadcast %cst_18 : f32 to vector<1x256xf32>
      %c0_19 = arith.constant 0 : index
      %c0_20 = arith.constant 0 : index
      %49 = vector.load %arg5[%c0_19, %c0_20] : memref<1x256xf32, #tpu.memory_space<vmem>>, vector<1x256xf32>
      tpu.vector_store %arg5[%c0_19, %c0_20], %48 {strides = array<i32>} : memref<1x256xf32, #tpu.memory_space<vmem>>, vector<1x256xf32>,
    } else {
    }
    %c0 = arith.constant 0 : index
    %c0_1 = arith.constant 0 : index
    %3 = vector.load %arg2[%c0, %c0_1] : memref<16x256xbf16, #tpu.memory_space<vmem>>, vector<16x256xbf16>
    %4 = arith.extf %3 : vector<16x256xbf16> to vector<16x256xf32>
    %cst = arith.constant dense<0xFF800000> : vector<256xf32>
    %5 = vector.multi_reduction <maximumf>, %4, %cst [0] : vector<16x256xf32> to vector<256xf32>
    %6 = vector.shape_cast %5 : vector<256xf32> to vector<1x256xf32>
    %7 = vector.broadcast %6 : vector<1x256xf32> to vector<16x256xf32>
    %8 = arith.subf %4, %7 : vector<16x256xf32>
    %9 = math.exp %8 : vector<16x256xf32>
    %cst_2 = arith.constant dense<0.000000e+00> : vector<256xf32>
    %10 = vector.multi_reduction <add>, %9, %cst_2 [0] : vector<16x256xf32> to vector<256xf32>
    %11 = vector.shape_cast %10 : vector<256xf32> to vector<1x256xf32>
    %12 = math.log %11 : vector<1x256xf32>
    %13 = vector.broadcast %12 : vector<1x256xf32> to vector<16x256xf32>
    %14 = arith.subf %8, %13 : vector<16x256xf32>
    %c0_3 = arith.constant 0 : index
    %c0_4 = arith.constant 0 : index
    %15 = vector.load %arg3[%c0_3, %c0_4] : memref<1x256xi32, #tpu.memory_space<vmem>>, vector<1x256xi32>
    %16 = tpu.iota {dimensions = array<i32: 0>} : vector<16x256xi32>
    %17 = vector.broadcast %15 : vector<1x256xi32> to vector<16x256xi32>
    %18 = arith.cmpi eq, %16, %17 : vector<16x256xi32>
    %cst_5 = arith.constant 0.000000e+00 : f32
    %19 = vector.broadcast %cst_5 : f32 to vector<16x256xf32>
    %20 = arith.select %18, %14, %19 : vector<16x256xi1>, vector<16x256xf32>
    %cst_6 = arith.constant dense<0.000000e+00> : vector<256xf32>
    %21 = vector.multi_reduction <add>, %20, %cst_6 [0] : vector<16x256xf32> to vector<256xf32>
    %22 = vector.shape_cast %21 : vector<256xf32> to vector<1x256xf32>
    %cst_7 = arith.constant dense<0.000000e+00> : vector<256xf32>
    %23 = vector.multi_reduction <add>, %14, %cst_7 [0] : vector<16x256xf32> to vector<256xf32>
    %24 = vector.shape_cast %23 : vector<256xf32> to vector<1x256xf32>
    %cst_8 = arith.constant 0.786666691 : f32
    %25 = vector.broadcast %cst_8 : f32 to vector<1x256xf32>
    %26 = arith.mulf %25, %22 : vector<1x256xf32>
    %cst_9 = arith.constant 0.0133333337 : f32
    %27 = vector.broadcast %cst_9 : f32 to vector<1x256xf32>
    %28 = arith.mulf %27, %24 : vector<1x256xf32>
    %29 = arith.addf %26, %28 : vector<1x256xf32>
    %cst_10 = arith.constant 0.000000e+00 : f32
    %30 = vector.broadcast %cst_10 : f32 to vector<1x256xf32>
    %31 = arith.subf %30, %29 : vector<1x256xf32>
    %c1_i32 = arith.constant 1 : i32
    %32 = arith.muli %arg0, %c1_i32 : i32
    %33 = arith.addi %32, %arg1 : i32
    %c256_i32 = arith.constant 256 : i32
    %34 = arith.muli %33, %c256_i32 : i32
    %35 = tpu.iota {dimensions = array<i32: 1>} : vector<1x256xi32>
    %36 = vector.broadcast %34 : i32 to vector<1x256xi32>
    %37 = arith.addi %36, %35 : vector<1x256xi32>
    %c500_i32 = arith.constant 500 : i32
    %38 = vector.broadcast %c500_i32 : i32 to vector<1x256xi32>
    %39 = arith.cmpi slt, %37, %38 : vector<1x256xi32>
    %cst_11 = arith.constant 0.000000e+00 : f32
    %40 = vector.broadcast %cst_11 : f32 to vector<1x256xf32>
    %41 = arith.select %39, %31, %40 : vector<1x256xi1>, vector<1x256xf32>
    %c0_12 = arith.constant 0 : index
    %c0_13 = arith.constant 0 : index
    %42 = vector.load %arg5[%c0_12, %c0_13] : memref<1x256xf32, #tpu.memory_space<vmem>>, vector<1x256xf32>
    %43 = arith.addf %42, %41 : vector<1x256xf32>
    %c0_14 = arith.constant 0 : index
    %c0_15 = arith.constant 0 : index
    %44 = vector.load %arg5[%c0_14, %c0_15] : memref<1x256xf32, #tpu.memory_space<vmem>>, vector<1x256xf32>
    tpu.vector_store %arg5[%c0_14, %c0_15], %43 {strides = array<i32>} : memref<1x256xf32, #tpu.memory_space<vmem>>, vector<1x256xf32>,
    %c0_i32_16 = arith.constant 0 : i32
    %45 = arith.cmpi eq, %arg1, %c0_i32_16 : i32
    %46 = arith.extui %45 : i1 to i32
    %c0_i32_17 = arith.constant 0 : i32
    %47 = arith.cmpi ne, %46, %c0_i32_17 : i32
    scf.if %47 {
      %c0_18 = arith.constant 0 : index
      %c0_19 = arith.constant 0 : index
      %48 = vector.load %arg5[%c0_18, %c0_19] : memref<1x256xf32, #tpu.memory_space<vmem>>, vector<1x256xf32>
      %49 = vector.shape_cast %48 : vector<1x256xf32> to vector<1x1x256xf32>
      %cst_20 = arith.constant dense<0.000000e+00> : vector<1xf32>
      %50 = vector.multi_reduction <add>, %49, %cst_20 [1, 2] : vector<1x1x256xf32> to vector<1xf32>
      %51 = vector.shape_cast %50 : vector<1xf32> to vector<1x1x1xf32>
      %52 = vector.extract %51[0, 0, 0] : f32 from vector<1x1x1xf32>
      %53 = vector.broadcast %52 : f32 to vector<1x8x128xf32>
      %c0_21 = arith.constant 0 : index
      %c0_22 = arith.constant 0 : index
      %c0_23 = arith.constant 0 : index
      %54 = vector.load %arg4[%c0_21, %c0_22, %c0_23] : memref<1x8x128xf32, #tpu.memory_space<vmem>>, vector<1x8x128xf32>
      tpu.vector_store %arg4[%c0_21, %c0_22, %c0_23], %53 {strides = array<i32>} : memref<1x8x128xf32, #tpu.memory_space<vmem>>, vector<1x8x128xf32>,
    } else {
    }
    return
  }
  func.func @transform_0(%arg0: i32, %arg1: i32) -> (i32, i32) {
    %c1_i32 = arith.constant 1 : i32
    %0 = arith.muli %arg0, %c1_i32 : i32
    %1 = arith.addi %0, %arg1 : i32
    %c0_i32 = arith.constant 0 : i32
    %c0_i32_0 = arith.constant 0 : i32
    return %c0_i32, %1 : i32, i32
  }
  func.func @transform_1(%arg0: i32, %arg1: i32) -> (i32, i32) {
    %c1_i32 = arith.constant 1 : i32
    %0 = arith.muli %arg0, %c1_i32 : i32
    %1 = arith.addi %0, %arg1 : i32
    %c0_i32 = arith.constant 0 : i32
    %c0_i32_0 = arith.constant 0 : i32
    return %c0_i32, %1 : i32, i32
  }
  func.func @transform_2(%arg0: i32, %arg1: i32) -> (i32, i32, i32) {
    %c0_i32 = arith.constant 0 : i32
    %c0_i32_0 = arith.constant 0 : i32
    %c0_i32_1 = arith.constant 0 : i32
    return %arg0, %c0_i32, %c0_i32_0 : i32, i32, i32
  }
}

</mosaic_0001>

<bundles_post_ra>
// kernel: tpu_custom_call.1
= control target key start
LH: loop header
LB: loop body
LE: loop exit
PB: predicated region body
PF: predicated region fallthrough
CT: control target
= control target key end

     0   :  { %7 = vsyncpa [#allocation4], 0  ;;  %s936_s0 = inlined_call_operand.hbm [shape: bf16[16,512], index: 0, kind: input, shape index: {}]   ;;  %s937_s1 = inlined_call_operand.hbm [shape: s32[1,512], index: 1, kind: input, shape index: {}]   ;;  %s938_s2 = inlined_call_operand.hbm [shape: f32[2,8,128], index: 2, kind: output, shape index: {}]  }
   0x1   :  { %9 = vsyncpa [#allocation4 + $0x1], 0 }
   0x2   :  { %10 = vsyncpa [#allocation7], 0 }
   0x3   :  { %12 = vsyncpa [#allocation7 + $0x1], 0 }
   0x4   :  { %13 = vsyncpa [#allocation5], 0 }
   0x5   :  { %15 = vsyncpa [#allocation5 + $0x1], 0  ;;  %s776_s9 = smov 0   ;;  %s778_s10 = smov 0  }
   0x6   :  { %s780_s11 = smov 0   ;;  %s782_s12 = smov 0  }
   0x7   :  { %s784_s13 = smov 0   ;;  %s786_s14 = smov 0  }
   0x8 LB: > { %s505_s15 = sadd.s32 4294967295, %s755_s14   ;;  %s506_s16 = sadd.s32 4294967294, %s755_s14   ;;  %s755_s14 = sphi %s786_s14, %s21_s14   ;;  %s751_s13 = sphi %s784_s13, %s950_s13   ;;  %s747_s12 = sphi %s782_s12, %s949_s12   ;;  %s743_s11 = sphi %s780_s11, %s948_s11   ;;  %s739_s10 = sphi %s778_s10, %s947_s10   ;;  %s735_s9 = sphi %s776_s9, %s946_s9  }
   0x9   : > { %s33_s17 = sadd.s32 1, %s751_s13  ;;  %s42_s18 = sadd.s32 1, %s743_s11 }
   0xa   : > { %p35_p0 = scmp.ge.s32.totalorder %s33_s17, 2  ;;  %p49_p1 = scmp.ne.s32.totalorder %s743_s11, %s739_s10 }
   0xb   : > { %p50_p2 = scmp.eq.s32.totalorder %s755_s14, 0  ;;  %p55_p3 = scmp.ne.s32.totalorder %s739_s10, %s735_s9 }
   0xc   : > { %s952_s17 = smov (%p35_p0, %s33_s17), 0  ;;  %p56_p5 = scmp.eq.s32.totalorder %s505_s15, 0 }
   0xd   : > { %p817_p4 = por %p50_p2, %p49_p1  ;;  %s39_s20 = ssub.s32 %s751_s13, %s952_s17 }
   0xe   : > { %p107_p6 = scmp.eq.s32.totalorder %s505_s15, 1  ;;  %p40_p7 = scmp.eq.s32.totalorder %s39_s20, 0 }
   0xf   : > { %p823_p8 = por %p56_p5, %p55_p3  ;;  %p113_p10 = scmp.eq.s32.totalorder %s506_s16, 1 }
  0x10   : > { %p827_p9 = por %p107_p6, %p49_p1  ;;  %p508_p12 = scmp.ge.s32.totalorder %s755_s14, 2 }
  0x11   : > { %s832_s23 = scalar_select %p40_p7, %s743_s11, %s42_s18  }
  0x12   : > { %p834_p11 = por %p113_p10, %p55_p3  ;;  %p543_p13 = scmp.lt.s32.totalorder %s755_s14, 2 }
  0x13   : > { %s841_s25 = sand.u32 1, %s743_s11   ;;  %s523_s27 = sshll.u32 %s751_s13, 3 }
  0x14   : > { %s509_s26 = sshll.u32 %s841_s25, 4  ;;  %s143_s30 = scalar_lea.hbm %s936_s0, %s523_s27 }
  0x15   : > { %s137_s3 = scalar_lea.vmem [#allocation3], %s509_s26  ;;  %s144_s5 = sshll.u32 %s143_s30, 4  ;;  %s145_s5 = int_to_ptr.hbm [resolvable:$true] %s144_s5 }
  0x16   : > { %s146_s4 = sshll.u32 %s137_s3, 4  ;;  %p850_p0 = pnand %p543_p13, %p817_p4  ;;  %s147_s4 = int_to_ptr.vmem [resolvable:$true] %s146_s4 }
  0x17   : > { %s134_s7 = scalar_lea.sflag [#allocation4], %s841_s25  ;;  %s757_s8 = smov 256  }
  0x18   : > { %s758_s15 = smov 128   ;;  %s759_s16 = smov 8  }
  0x19   : > { %535 = dma.hbm_to_vmem [thread:$0]  (!%p850_p0), %s145_s5, 256, %s147_s4, %s134_s7, %s757_s8, %s758_s15, %s759_s16  }
  0x1a   : > { %p514_p1 = scmp.ge.s32.totalorder %s755_s14, 1  ;;  %p174_p2 = scmp.lt.s32.totalorder %s755_s14, 3 }
  0x1b   : > { %s512_s18 = sshll.u32 %s841_s25, 1  ;;  %s513_s20 = sshll.u32 %s751_s13, 1 }
  0x1c   : > { %p175_p3 = pnand %p514_p1, %p174_p2  ;;  %s160_s26 = scalar_lea.vmem [#allocation6], %s512_s18 }
  0x1d   : > { %s169_s19 = sshll.u32 %s160_s26, 4  ;;  %s165_s29 = scalar_lea.hbm %s937_s1, %s513_s20  ;;  %s170_s19 = int_to_ptr.vmem [resolvable:$true] %s169_s19 }
  0x1e   : > { %s167_s30 = sshll.u32 %s165_s29, 4  ;;  %s157_s3 = scalar_lea.sflag [#allocation7], %s841_s25  ;;  %s168_s30 = int_to_ptr.hbm [resolvable:$true] %s167_s30 }
  0x1f   : > { %538 = dma.hbm_to_vmem [thread:$0]  (!%p850_p0), %s168_s30, 32, %s170_s19, %s157_s3  }
  0x20   : > { %178 = sbr.rel (%p175_p3) target bundleno = 319 (0x13f), region = 28  ;;  %s868_s4 = sand.u32 (!%p175_p3), 1, %s739_s10  }
  0x21   : > { %s515_s5 = sshll.u32 (!%p175_p3), %s868_s4, 4  ;;  %s181_s7 = scalar_lea.sflag (!%p175_p3), [#allocation4], %s868_s4 }
  0x22   : > { %s184_s8 = scalar_lea.vmem (!%p175_p3), [#allocation3], %s515_s5 }
  0x25   : > { %722 = dma.done.wait (%p823_p8), %s181_s7, 256  }
  0x26   : > { %724 = vsyncadd (%p823_p8), %s181_s7, 4294967040  ;;  %s516_s25 = sshll.u32 %s868_s4, 1  ;;  %s191_s6 = scalar_lea.sflag [#allocation7], %s868_s4 }
  0x27   : > { %s878_s15 = scalar_lea.vmem [#allocation6], %s516_s25 }
  0x28   : > { %726 = dma.done.wait (%p823_p8), %s191_s6, 32  }
  0x29   : > { %728 = vsyncadd (%p823_p8), %s191_s6, 4294967264  ;;  %v229_v0 = vlaneseq  ;;  %v760_v2 = vmov 0.0   ;;  %v234_v3 = vld [vmem:[%s184_s8] sm:$0xff]  ;;  %v235_v4 = vld [vmem:[%s184_s8 + $0x8] sm:$0xff]  ;;  %s518_s21 = sshll.u32 %s747_s12, 8  ;;  %vm354_vm7 = vcmask 1040384  }
  0x2a   : > { %v236_v5 = vunpack.c.l.bf16 %v234_v3  ;;  %v237_v6 = vunpack.c.h.bf16 %v234_v3  ;;  %v238_v7 = vunpack.c.l.bf16 %v235_v4  ;;  %v239_v8 = vunpack.c.h.bf16 %v235_v4  ;;  %v288_v50 = vld [vmem:[%s878_s15] sm:$0x3]  ;;  %s517_s16 = sshll.u32 %s868_s4, 3  ;;  %s520_s18 = sshll.u32 %s747_s12, 3 }
  0x2b   : > { %vm885_vm0 = vcmp.lt.s32.totalorder %v229_v0, 256  ;;  %v290_v49 = vshrl.u32 %v229_v0, 7  ;;  %v292_v51 = vperm.slane %v288_v50, 0  ;;  %v293_v53 = vperm.slane %v288_v50, 1  ;;  %s397_s19 = scalar_lea.hbm %s938_s2, %s520_s18  ;;  %s220_s27 = scalar_lea.vmem [#allocation8], %s517_s16 }
  0x2c   : > { %233 = vst.msk [vmem:[#allocation2] sm:$0x3] %vm885_vm0, %v760_v2  ;;  %v240_v9 = vmax.f32 %v236_v5, %v238_v7  ;;  %v247_v10 = vmax.f32 %v237_v6, %v239_v8  ;;  %s399_s28 = sshll.u32 %s220_s27, 4  ;;  %s401_s29 = sshll.u32 %s397_s19, 4  ;;  %s400_s28 = int_to_ptr.vmem [resolvable:$true] %s399_s28  ;;  %s402_s29 = int_to_ptr.hbm [resolvable:$true] %s401_s29 }
  0x2d   : > { %v291_v52 = vadd.s32 8, %v290_v49  ;;  %vm294_vm1 = vcmp.eq.s32.totalorder %v290_v49, %v292_v51  ;;  %vm295_vm3 = vcmp.eq.s32.totalorder %v290_v49, %v293_v53  ;;  %s387_s3 = scalar_lea.sflag [#allocation5], %s868_s4  ;;  %s683_s5 = sshra.s32 %s402_s29, 4  ;;  %s684_s5 = int_to_ptr.hbm [resolvable:$true] %s683_s5 }
  0x2e   : > { %v241_v11 = vrot.slane %v240_v9, 4  ;;  %v248_v12 = vrot.slane %v247_v10, 4  ;;  %s685_s7 = scalar_lea.hbm %s684_s5, 8  ;;  %s689_s25 = scalar_lea.hbm %s938_s2, 16 }
  0x2f   : > { %vm296_vm2 = vcmp.eq.s32.totalorder %v291_v52, %v292_v51  ;;  %vm297_vm4 = vcmp.eq.s32.totalorder %v291_v52, %v293_v53  ;;  %p686_p4 = scmp.ne.s32.totalorder %s684_s5, %s685_s7  ;;  %p690_p7 = scmp.lt.s32.totalorder %s684_s5, %s938_s2 }
  0x30   : > { %v242_v13 = vmax.f32 %v240_v9, %v241_v11  ;;  %v249_v14 = vmax.f32 %v247_v10, %v248_v12  ;;  %p691_p8 = scmp.lt.s32.totalorder %s689_s25, %s685_s7 }
  0x31   : > { %p687_p5 = pnand %p686_p4, %p827_p9 }
  0x32   : > { %v243_v15 = vrot.slane %v242_v13, 2  ;;  %v250_v16 = vrot.slane %v249_v14, 2  ;;  %p692_p10 = por %p691_p8, %p690_p7 }
  0x33   : > { %p688_p6 = pneg %p687_p5 }
  0x34   : > { %v244_v17 = vmax.f32 %v242_v13, %v243_v15  ;;  %v251_v18 = vmax.f32 %v249_v14, %v250_v16 }
  0x35   : > { %p693_p13 = pnand %p692_p10, %p688_p6 }
  0x36   : > { %v245_v19 = vrot.slane %v244_v17, 1  ;;  %v252_v20 = vrot.slane %v251_v18, 1 }
  0x38   : > { %v246_v21 = vmax.f32 %v244_v17, %v245_v19  ;;  %v253_v22 = vmax.f32 %v251_v18, %v252_v20  ;;  %v341_v19 = vand.u32 127, %v229_v0 }
  0x3a   : > { %v254_v23 = vsub.f32 %v236_v5, %v246_v21  ;;  %v255_v24 = vsub.f32 %v237_v6, %v253_v22  ;;  %v256_v25 = vsub.f32 %v238_v7, %v246_v21  ;;  %v257_v26 = vsub.f32 %v239_v8, %v253_v22 }
  0x3c   : > { %v258_v27 = vmul.f32 1.442695, %v254_v23  ;;  %v260_v28 = vmul.f32 1.442695, %v255_v24  ;;  %v262_v29 = vmul.f32 1.442695, %v256_v25 }
  0x3d   : > { %v264_v30 = vmul.f32 1.442695, %v257_v26 }
  0x3e   : > { %597 = vpow2.f32 %v258_v27 }
  0x3f   : > { %599 = vpow2.f32 %v260_v28  ;;  %v342_v28 = vadd.s32 128, %v341_v19 }
  0x40   : > { %601 = vpow2.f32 %v262_v29 }
  0x41   : > { %603 = vpow2.f32 %v264_v30 }
  0x44   : > { %v598_v31 = vpop.eup %597 }
  0x45   : > { %v600_v32 = vpop.eup %599 }
  0x46   : > { %v602_v33 = vpop.eup %601 }
  0x47   : > { %v604_v34 = vpop.eup %603  ;;  %v266_v35 = vadd.f32 %v602_v33, %v598_v31  ;;  %v343_v31 = vstv %s518_s21 }
  0x48   : > { %v273_v36 = vadd.f32 %v604_v34, %v600_v32  ;;  %v344_v0 = vadd.s32 %v343_v31, %v341_v19 }
  0x49   : > { %v267_v37 = vrot.slane %v266_v35, 4 }
  0x4a   : > { %v274_v38 = vrot.slane %v273_v36, 4  ;;  %vm346_vm5 = vcmp.lt.s32.totalorder %v344_v0, 500 }
  0x4b   : > { %v268_v39 = vadd.f32 %v267_v37, %v266_v35 }
  0x4c   : > { %v275_v40 = vadd.f32 %v274_v38, %v273_v36  ;;  %v345_v38 = vadd.s32 %v343_v31, %v342_v28 }
  0x4d   : > { %v269_v41 = vrot.slane %v268_v39, 2 }
  0x4e   : > { %v276_v42 = vrot.slane %v275_v40, 2  ;;  %vm347_vm6 = vcmp.lt.s32.totalorder %v345_v38, 500 }
  0x4f   : > { %v270_v43 = vadd.f32 %v269_v41, %v268_v39 }
  0x50   : > { %v277_v44 = vadd.f32 %v276_v42, %v275_v40 }
  0x51   : > { %v271_v45 = vrot.slane %v270_v43, 1 }
  0x52   : > { %v278_v46 = vrot.slane %v277_v44, 1 }
  0x53   : > { %v272_v47 = vadd.f32 %v271_v45, %v270_v43 }
  0x54   : > { %v279_v48 = vadd.f32 %v278_v46, %v277_v44  ;;  %v350_v46 = vld [vmem:[#allocation2] sm:$0x3] }
  0x55   : > { %605 = vlog2.f32 %v272_v47 }
  0x56   : > { %607 = vlog2.f32 %v279_v48 }
  0x5b   : > { %v606_v54 = vpop.eup %605 }
  0x5c   : > { %v608_v55 = vpop.eup %607  ;;  %v281_v56 = vmul.f32 0.6931472, %v606_v54 }
  0x5d   : > { %v283_v57 = vmul.f32 0.6931472, %v608_v55 }
  0x5e   : > { %v284_v58 = vsub.f32 %v254_v23, %v281_v56  ;;  %v286_v59 = vsub.f32 %v256_v25, %v281_v56 }
  0x5f   : > { %v285_v60 = vsub.f32 %v255_v24, %v283_v57  ;;  %v287_v61 = vsub.f32 %v257_v26, %v283_v57 }
  0x60   : > { %v298_v62 = vsel %vm294_vm1, %v284_v58, 0.0  ;;  %v300_v63 = vsel %vm296_vm2, %v286_v59, 0.0  ;;  %v316_v2 = vadd.f32 %v286_v59, %v284_v58 }
  0x61   : > { %v299_v3 = vsel %vm295_vm3, %v285_v60, 0.0  ;;  %v301_v4 = vsel %vm297_vm4, %v287_v61, 0.0  ;;  %v302_v5 = vadd.f32 %v300_v63, %v298_v62  ;;  %v323_v6 = vadd.f32 %v287_v61, %v285_v60 }
  0x62   : > { %v309_v7 = vadd.f32 %v301_v4, %v299_v3  ;;  %v317_v8 = vrot.slane %v316_v2, 4 }
  0x63   : > { %v303_v9 = vrot.slane %v302_v5, 4  ;;  %v324_v10 = vrot.slane %v323_v6, 4 }
  0x64   : > { %v310_v11 = vrot.slane %v309_v7, 4  ;;  %v318_v12 = vadd.f32 %v317_v8, %v316_v2 }
  0x65   : > { %v304_v13 = vadd.f32 %v303_v9, %v302_v5  ;;  %v325_v14 = vadd.f32 %v324_v10, %v323_v6 }
  0x66   : > { %v311_v15 = vadd.f32 %v310_v11, %v309_v7  ;;  %v319_v16 = vrot.slane %v318_v12, 2 }
  0x67   : > { %v305_v17 = vrot.slane %v304_v13, 2  ;;  %v326_v18 = vrot.slane %v325_v14, 2 }
  0x68   : > { %v312_v20 = vrot.slane %v311_v15, 2  ;;  %v320_v21 = vadd.f32 %v319_v16, %v318_v12 }
  0x69   : > { %v306_v22 = vadd.f32 %v305_v17, %v304_v13  ;;  %v327_v23 = vadd.f32 %v326_v18, %v325_v14 }
  0x6a   : > { %v313_v24 = vadd.f32 %v312_v20, %v311_v15  ;;  %v321_v25 = vrot.slane %v320_v21, 1 }
  0x6b   : > { %v307_v26 = vrot.slane %v306_v22, 1  ;;  %v328_v27 = vrot.slane %v327_v23, 1 }
  0x6c   : > { %v314_v29 = vrot.slane %v313_v24, 1  ;;  %v322_v30 = vadd.f32 %v321_v25, %v320_v21 }
  0x6d   : > { %v308_v32 = vadd.f32 %v307_v26, %v306_v22  ;;  %v329_v33 = vadd.f32 %v328_v27, %v327_v23 }
  0x6e   : > { %v315_v34 = vadd.f32 %v314_v29, %v313_v24  ;;  %v332_v35 = vmul.f32 0.013333334, %v322_v30 }
  0x6f   : > { %v330_v36 = vmul.f32 0.7866667, %v308_v32  ;;  %v333_v37 = vmul.f32 0.013333334, %v329_v33 }
  0x70   : > { %v331_v39 = vmul.f32 0.7866667, %v315_v34 }
  0x71   : > { %v334_v40 = vadd.f32 %v332_v35, %v330_v36 }
  0x72   : > { %v335_v41 = vadd.f32 %v333_v37, %v331_v39 }
  0x73   : > { %v336_v42 = vsub.f32 0.0, %v334_v40 }
  0x74   : > { %v337_v43 = vsub.f32 0.0, %v335_v41 }
  0x75   : > { %v348_v44 = vsel %vm346_vm5, %v336_v42, 0.0 }
  0x76   : > { %v349_v45 = vsel %vm347_vm6, %v337_v43, 0.0 }
  0x77   : > { %v353_v47 = vrot.slane %v349_v45, 7 }
  0x79   : > { %v355_v48 = vsel %vm354_vm7, %v348_v44, %v353_v47 }
  0x7a   : > { %v357_v49 = vadd.f32 %v355_v48, %v350_v46 }
  0x7c   : > { %362 = vst.msk [vmem:[#allocation2] sm:$0x3] %vm885_vm0, %v357_v49 }
  0x83   : > { %v366_v50 = vld [vmem:[#allocation2] sm:$0x3] }
  0x84   : > { %v368_v51 = vperm.slane %v366_v50, 0  ;;  %v369_v52 = vperm.slane %v366_v50, 1 }
  0x86   : > { %v372_v53 = vsel %vm354_vm7, %v368_v51, 0.0  ;;  %v373_v54 = vsel %vm354_vm7, %v369_v52, 0.0 }
  0x87   : > { %v374_v55 = vadd.f32 %v373_v54, %v372_v53 }
  0x89   : > { %375 = vadd.xlane.f32.xlu0 %v374_v55 }
  0xfc   : > { %v376_v56 = vpop.xlane.xlu0 %375 }
  0xfd   : > { %v377_v57 = vrot.slane %v376_v56, 4 }
  0xff   : > { %v378_v58 = vadd.f32 %v377_v57, %v376_v56 }
 0x101   : > { %v379_v59 = vrot.slane %v378_v58, 2 }
 0x103   : > { %v380_v60 = vadd.f32 %v379_v59, %v378_v58 }
 0x105   : > { %v381_v61 = vrot.slane %v380_v60, 1 }
 0x107   : > { %v382_v62 = vadd.f32 %v381_v61, %v380_v60 }
 0x109   : > { %524 = vpush %v382_v62 }
 0x13a   : > { %s525_s30 = spop %524 }
 0x13b   : > { %v384_v1 = vstv %s525_s30 }
 0x13c   : > { %385 = vst [vmem:[%s220_s27] sm:$0xff] %v384_v1 }
 0x13d   : > { %696 = shalt.err (!%p693_p13)
}
 0x13e   : > { %530 = dma.vmem_to_hbm [thread:$0]  (%p827_p9), %s400_s28, 128, %s402_s29, %s387_s3  }
 0x13f PF: > { %s413_s4 = sand.u32 1, %s735_s9   ;;  %p540_p0 = pnand %p508_p12, %p834_p11 }
 0x140   : > { %s414_s21 = scalar_lea.sflag [#allocation5], %s413_s4 }
 0x141   : > { %p541_p1 = pneg %p540_p0 }
 0x143   : > { %730 = dma.done.wait (%p541_p1), %s414_s21, 128  }
 0x144   : > { %732 = vsyncadd (%p541_p1), %s414_s21, 4294967168  ;;  %s21_s14 = sadd.s32 1, %s755_s14   ;;  %s946_s9 = smov %s739_s10 }
 0x145   : > { %p18_p2 = scmp.ge.s32.totalorder %s21_s14, 4   ;;  %s947_s10 = smov %s743_s11 }
 0x146   : > { %s948_s11 = smov %s832_s23  ;;  %s949_s12 = smov %s751_s13 }
 0x147   : > { %s950_s13 = smov %s952_s17  ;;  %20 = sbr.rel (!%p18_p2) target bundleno = 8 (0x8), region = 94 }
 0x14c   :  { %420 = vsyncpa [#allocation4], 1 }
 0x14d   :  { %422 = vsyncpa [#allocation4 + $0x1], 1 }
 0x14e   :  { %423 = vsyncpa [#allocation7], 1 }
 0x14f   :  { %425 = vsyncpa [#allocation7 + $0x1], 1 }
 0x150   :  { %426 = vsyncpa [#allocation5], 1 }
 0x151   :  { %428 = vsyncpa [#allocation5 + $0x1], 1 }

</bundles_post_ra>
